<compile_context>
chip_gen: v7x
topology: tpu7x:2x2x1
jax: 0.10.0
libtpu: 0.0.40
codegen_flags: <defaults>
</compile_context>

<pallas_src>
import functools

import jax
import jax.numpy as jnp
from jax.experimental import pallas as pl
from jax.experimental.pallas import tpu as pltpu


def _inspiration_kernel(w_ref, g_ref, x_ref, o_ref, pt_ref, *, operand_dtype=None):
    """One grid step = (image n, spatial tile s).

    w_ref : (C, C)    learned style-blending weight (leading 1 squeezed)
    g_ref : (C, C)    target Gram matrix for this image's style
    x_ref : (C, THW)  spatial tile of the flattened input feature map
    o_ref : (C, THW)  matching output tile
    pt_ref: (C, C)    VMEM scratch holding P^T = (W @ G)^T, reused across tiles
    """
    # Hoisted invariant work: P^T does not depend on the spatial tile, so only
    # compute it on the first tile of each image and keep it in VMEM scratch.
    @pl.when(pl.program_id(1) == 0)
    def _():
        p = jnp.dot(w_ref[...].astype(jnp.float32),
                    g_ref[...].astype(jnp.float32),
                    preferred_element_type=jnp.float32)
        pt_ref[...] = p.T

    pt = pt_ref[...]
    x = x_ref[...]
    if operand_dtype is not None:
        # Optional bf16 MXU operands (f32 accumulation) for very large C.
        pt = pt.astype(operand_dtype)
        x = x.astype(operand_dtype)
    else:
        x = x.astype(jnp.float32)

    o_ref[...] = jnp.dot(pt, x, preferred_element_type=jnp.float32).astype(o_ref.dtype)


def _choose_spatial_tile(C, HW, dtype_bytes=4, target_tile_bytes=4 * 1024 * 1024):
    """Largest lane-dense (multiple-of-128) spatial tile within a VMEM budget.

    Keeps (in + out) double-buffered tiles well under the default scoped VMEM
    limit (32 MiB) while staying wide enough (>=512 lanes whenever possible)
    to amortize per-grid-step overhead and keep stores unmasked.
    """
    if HW * C * dtype_bytes <= target_tile_bytes:
        return HW                              # whole pixel row fits: one tile
    tile = (target_tile_bytes // (C * dtype_bytes)) // 128 * 128
    return int(max(128, min(tile, HW)))


def inspiration_forward(X, weight, G, *, operand_dtype=None,
                        target_tile_bytes=4 * 1024 * 1024, interpret=False):
    """JAX/Pallas equivalent of Inspiration.forward(X).

    X      : (N, C, H, W)  content features
    weight : (1, C, C)     learned style-blending matrix
    G      : (B, C, C)     target Gram matrices (B == 1 or B == N, as PyTorch expand allows)
    """
    N, C, H, W = X.shape
    Bw, Cw, Cw2 = weight.shape
    Bg, Cg, Cg2 = G.shape
    assert Bw == 1 and Cw == C and Cw2 == C, "weight must be (1, C, C)"
    assert Cg == C and Cg2 == C and Bg in (1, N), "G must be (1, C, C) or (N, C, C)"

    HW = H * W
    X_flat = X.reshape(N, C, HW)

    THW = _choose_spatial_tile(C, HW, dtype_bytes=X.dtype.itemsize,
                               target_tile_bytes=target_tile_bytes)
    n_s = pl.cdiv(HW, THW)

    if Bg == 1:
        g_index = lambda n, s: (0, 0, 0)     # single shared style target
    else:
        g_index = lambda n, s: (n, 0, 0)     # per-image style target

    kernel = functools.partial(_inspiration_kernel, operand_dtype=operand_dtype)

    # Advisory hint for the XLA scheduler around the custom call.
    itemsize = X.dtype.itemsize
    cost = pl.CostEstimate(
        flops=2 * N * C * C * HW + 2 * N * C * C * C,
        transcendentals=0,
        bytes_accessed=2 * N * C * HW * itemsize
        + weight.size * weight.dtype.itemsize
        + G.size * G.dtype.itemsize,
    )

    out_flat = pl.pallas_call(
        kernel,
        out_shape=jax.ShapeDtypeStruct((N, C, HW), X.dtype),
        grid=(N, n_s),
        in_specs=[
            pl.BlockSpec((pl.Squeezed(), C, C), lambda n, s: (0, 0, 0)),     # weight
            pl.BlockSpec((pl.Squeezed(), C, C), g_index),                    # G
            pl.BlockSpec((pl.Squeezed(), C, THW), lambda n, s: (n, 0, s)),   # X
        ],
        out_specs=pl.BlockSpec((pl.Squeezed(), C, THW), lambda n, s: (n, 0, s)),
        scratch_shapes=[pltpu.VMEM((C, C), jnp.float32)],
        compiler_params=pltpu.CompilerParams(
            dimension_semantics=("parallel", "arbitrary")),
        cost_estimate=cost,
        interpret=interpret,
    )(weight, G, X_flat)

    return out_flat.reshape(N, C, H, W)


def _inspiration_reference(X, weight, G):
    """Pure-JAX reference mirroring the PyTorch module exactly."""
    N, C, H, W = X.shape
    P = jnp.matmul(weight, G, precision=jax.lax.Precision.HIGHEST)   # (B, C, C)
    PT = jnp.swapaxes(P, 1, 2)
    if PT.shape[0] == 1:
        PT = jnp.broadcast_to(PT, (N, C, C))
    Y = jnp.matmul(PT, X.reshape(N, C, H * W),
                   precision=jax.lax.Precision.HIGHEST)
    return Y.reshape(N, C, H, W)


def _run_case(key, N, C, H, W, B, **fwd_kwargs):
    k1, k2, k3 = jax.random.split(key, 3)
    X = jax.random.normal(k1, (N, C, H, W), dtype=jnp.float32)
    # reset_parameters(): weight ~ U(0, 0.02)
    weight = jax.random.uniform(k2, (1, C, C), dtype=jnp.float32,
                                minval=0.0, maxval=0.02)
    # setTarget(): a Gram-style target statistics matrix
    feats = jax.random.normal(k3, (B, C, H * W), dtype=jnp.float32)
    G = jnp.einsum('bcm,bdm->bcd', feats, feats) / (H * W)

    out = inspiration_forward(X, weight, G, **fwd_kwargs)
    jax.block_until_ready(out)

    ref = _inspiration_reference(X, weight, G)
    assert out.shape == X.shape
    max_err = float(jnp.max(jnp.abs(out - ref)))
    assert jnp.allclose(out, ref, atol=5e-3, rtol=5e-3), (
        "max abs err = %g" % max_err)


if __name__ == "__main__":
    key = jax.random.PRNGKey(0)
    k_a, k_b, k_c = jax.random.split(key, 3)

    # 1) Module-default configuration: one shared target style (B=1).
    _run_case(k_a, N=2, C=32, H=16, W=16, B=1)

    # 2) Per-image target styles (B=N), exercising the per-image G index map.
    _run_case(k_b, N=2, C=32, H=16, W=16, B=2)

    # 3) Force multiple spatial tiles (tiny tile budget) to exercise the
    #    hoisted-P^T / masked-boundary path.
    _run_case(k_c, N=2, C=32, H=16, W=16, B=1,
              target_tile_bytes=128 * 32 * 4)

    print("KERNEL_OK")
</pallas_src>

<mosaic_0001>
module attributes {stable_mosaic.version = 11 : i64} {
  func.func @_inspiration_kernel(%arg0: i32, %arg1: i32, %arg2: memref<1x32x32xf32, #tpu.memory_space<vmem>>, %arg3: memref<1x32x32xf32, #tpu.memory_space<vmem>>, %arg4: memref<1x32x256xf32, #tpu.memory_space<vmem>>, %arg5: memref<1x32x256xf32, #tpu.memory_space<vmem>>, %arg6: memref<32x32xf32, #tpu.memory_space<vmem>>) attributes {dimension_semantics = [#tpu.dimension_semantics<parallel>, #tpu.dimension_semantics<arbitrary>], iteration_bounds = array<i64: 2, 1>, scalar_prefetch = 0 : i64, scratch_operands = 1 : i64, tpu.core_type = #tpu.core_type<tc>, window_params = [{pipeline_mode = #tpu.pipeline_mode<synchronous>, transform_indices = @transform_0, window_bounds = array<i64: 1, 32, 32>}, {pipeline_mode = #tpu.pipeline_mode<synchronous>, transform_indices = @transform_1, window_bounds = array<i64: 1, 32, 32>}, {transform_indices = @transform_2, window_bounds = array<i64: 1, 32, 256>}, {transform_indices = @transform_3, window_bounds = array<i64: 1, 32, 256>}]} {
    %c0_i32 = arith.constant 0 : i32
    %0 = arith.cmpi eq, %arg1, %c0_i32 : i32
    %1 = arith.extui %0 : i1 to i32
    %c0_i32_0 = arith.constant 0 : i32
    %2 = arith.cmpi ne, %1, %c0_i32_0 : i32
    scf.if %2 {
      %c0_8 = arith.constant 0 : index
      %c0_9 = arith.constant 0 : index
      %c0_10 = arith.constant 0 : index
      %10 = vector.load %arg2[%c0_8, %c0_9, %c0_10] : memref<1x32x32xf32, #tpu.memory_space<vmem>>, vector<1x32x32xf32>
      %11 = vector.shape_cast %10 : vector<1x32x32xf32> to vector<32x32xf32>
      %c0_11 = arith.constant 0 : index
      %c0_12 = arith.constant 0 : index
      %c0_13 = arith.constant 0 : index
      %12 = vector.load %arg3[%c0_11, %c0_12, %c0_13] : memref<1x32x32xf32, #tpu.memory_space<vmem>>, vector<1x32x32xf32>
      %13 = vector.shape_cast %12 : vector<1x32x32xf32> to vector<32x32xf32>
      %cst_14 = arith.constant dense<0.000000e+00> : vector<32x32xf32>
      %14 = tpu.matmul %11, %13, %cst_14 {dimension_numbers = #tpu.dot_dimension_numbers<[1], [0], [0], [1], [0, 0, 1, 1], [], []>} : vector<32x32xf32>, vector<32x32xf32>, vector<32x32xf32> -> vector<32x32xf32>
      %15 = tpu.transpose %14, [1, 0] : vector<32x32xf32> -> vector<32x32xf32>
      %c0_15 = arith.constant 0 : index
      %c0_16 = arith.constant 0 : index
      %16 = vector.load %arg6[%c0_15, %c0_16] : memref<32x32xf32, #tpu.memory_space<vmem>>, vector<32x32xf32>
      tpu.vector_store %arg6[%c0_15, %c0_16], %15 {strides = array<i32>} : memref<32x32xf32, #tpu.memory_space<vmem>>, vector<32x32xf32>,
    } else {
    }
    %c0 = arith.constant 0 : index
    %c0_1 = arith.constant 0 : index
    %3 = vector.load %arg6[%c0, %c0_1] : memref<32x32xf32, #tpu.memory_space<vmem>>, vector<32x32xf32>
    %c0_2 = arith.constant 0 : index
    %c0_3 = arith.constant 0 : index
    %c0_4 = arith.constant 0 : index
    %4 = vector.load %arg4[%c0_2, %c0_3, %c0_4] : memref<1x32x256xf32, #tpu.memory_space<vmem>>, vector<1x32x256xf32>
    %5 = vector.shape_cast %4 : vector<1x32x256xf32> to vector<32x256xf32>
    %cst = arith.constant dense<0.000000e+00> : vector<32x256xf32>
    %6 = tpu.matmul %3, %5, %cst {dimension_numbers = #tpu.dot_dimension_numbers<[1], [0], [0], [1], [0, 0, 1, 1], [], []>} : vector<32x32xf32>, vector<32x256xf32>, vector<32x256xf32> -> vector<32x256xf32>
    %c0_5 = arith.constant 0 : index
    %c0_6 = arith.constant 0 : index
    %c0_7 = arith.constant 0 : index
    %7 = vector.load %arg5[%c0_5, %c0_6, %c0_7] : memref<1x32x256xf32, #tpu.memory_space<vmem>>, vector<1x32x256xf32>
    %8 = vector.shape_cast %7 : vector<1x32x256xf32> to vector<32x256xf32>
    %9 = vector.shape_cast %6 : vector<32x256xf32> to vector<1x32x256xf32>
    tpu.vector_store %arg5[%c0_5, %c0_6, %c0_7], %9 {strides = array<i32>} : memref<1x32x256xf32, #tpu.memory_space<vmem>>, vector<1x32x256xf32>,
    return
  }
  func.func @transform_0(%arg0: i32, %arg1: i32) -> (i32, i32, i32) {
    %c0_i32 = arith.constant 0 : i32
    %c0_i32_0 = arith.constant 0 : i32
    %c0_i32_1 = arith.constant 0 : i32
    %c0_i32_2 = arith.constant 0 : i32
    return %c0_i32, %c0_i32_0, %c0_i32_1 : i32, i32, i32
  }
  func.func @transform_1(%arg0: i32, %arg1: i32) -> (i32, i32, i32) {
    %c0_i32 = arith.constant 0 : i32
    %c0_i32_0 = arith.constant 0 : i32
    %c0_i32_1 = arith.constant 0 : i32
    %c0_i32_2 = arith.constant 0 : i32
    return %c0_i32, %c0_i32_0, %c0_i32_1 : i32, i32, i32
  }
  func.func @transform_2(%arg0: i32, %arg1: i32) -> (i32, i32, i32) {
    %c0_i32 = arith.constant 0 : i32
    %c0_i32_0 = arith.constant 0 : i32
    return %arg0, %c0_i32, %arg1 : i32, i32, i32
  }
  func.func @transform_3(%arg0: i32, %arg1: i32) -> (i32, i32, i32) {
    %c0_i32 = arith.constant 0 : i32
    %c0_i32_0 = arith.constant 0 : i32
    return %arg0, %c0_i32, %arg1 : i32, i32, i32
  }
}

</mosaic_0001>

<bundles_post_ra>
// kernel: tpu_custom_call.1
= control target key start
LH: loop header
LB: loop body
LE: loop exit
PB: predicated region body
PF: predicated region fallthrough
CT: control target
= control target key end

     0   :  { %8 = vsyncpa [#allocation4], 0  ;;  %s1281_s0 = inlined_call_operand.hbm [shape: f32[1,32,32], index: 0, kind: input, shape index: {}]   ;;  %s1282_s1 = inlined_call_operand.hbm [shape: f32[1,32,32], index: 1, kind: input, shape index: {}]   ;;  %s1283_s2 = inlined_call_operand.hbm [shape: f32[2,32,256], index: 2, kind: input, shape index: {}]   ;;  %s1284_s3 = inlined_call_operand.hbm [shape: f32[2,32,256], index: 3, kind: output, shape index: {}]  }
   0x1   :  { %9 = vsyncpa [#allocation7], 0 }
   0x2   :  { %10 = vsyncpa [#allocation5], 0 }
   0x3   :  { %12 = vsyncpa [#allocation5 + $0x1], 0  ;;  %s996_s12 = smov 0   ;;  %s998_s13 = smov 0  }
   0x4   :  { %s1000_s14 = smov 0   ;;  %s1002_s15 = smov 0  }
   0x5   :  { %s1004_s16 = smov 0   ;;  %s1006_s17 = smov 0  }
   0x6 LB: > { %s1027_s18 = sadd.s32 4294967295, %s963_s17   ;;  %s627_s19 = sadd.s32 4294967294, %s963_s17   ;;  %s963_s17 = sphi %s1006_s17, %s18_s17   ;;  %s959_s16 = sphi %s1004_s16, %s1307_s16   ;;  %s955_s15 = sphi %s1002_s15, %s1306_s15   ;;  %s951_s14 = sphi %s1000_s14, %s1305_s14   ;;  %s947_s13 = sphi %s998_s13, %s1304_s13   ;;  %s943_s12 = sphi %s996_s12, %s1303_s12  }
   0x7   : > { %p88_p0 = scmp.ne.s32.totalorder %s951_s14, %s947_s13  ;;  %p89_p1 = scmp.eq.s32.totalorder %s963_s17, 0 }
   0x8   : > { %p94_p2 = scmp.ne.s32.totalorder %s947_s13, %s943_s12  ;;  %p1285_p3 = scmp.eq.s32.totalorder %s1027_s18, 0 }
   0x9   : > { %p1036_p4 = por %p89_p1, %p88_p0  ;;  %p120_p5 = scmp.eq.s32.totalorder %s1027_s18, 1 }
   0xa   : > { %p1043_p6 = por %p1285_p3, %p94_p2  ;;  %p126_p7 = scmp.eq.s32.totalorder %s627_s19, 1 }
   0xb   : > { %p1047_p8 = por %p120_p5, %p88_p0  ;;  %p628_p9 = scmp.ge.s32.totalorder %s963_s17, 1 }
   0xc   : > { %s1289_s21 = scalar_select %p1043_p6, 1, 0 }
   0xd   : > { %s1290_s22 = scalar_select %p1047_p8, 1, 0 }
   0xe   : > { %p1052_p10 = por %p126_p7, %p94_p2  ;;  %p133_p11 = scmp.lt.s32.totalorder %s963_s17, 3 }
   0xf   : > { %s965_s25 = smov [#allocation3]   ;;  %p726_p1 = scmp.lt.s32.totalorder %s963_s17, 2 }
  0x10   : > { %s1291_s23 = scalar_select %p1052_p10, 1, 0 }
  0x11   : > { %p1057_p12 = pnand %p628_p9, %p133_p11  ;;  %s145_s26 = sshll.u32 %s965_s25, 4  ;;  %s1061_s26 = int_to_ptr.vmem [resolvable:$true] %s145_s26 }
  0x12   : > { %p1075_p2 = pnand %p726_p1, %p1036_p4  ;;  %s966_s29 = smov [#allocation6]  }
  0x13   : > { %p709_p13 = pneg %p1057_p12  ;;  %s158_s30 = sshll.u32 %s966_s29, 4  ;;  %s1079_s30 = int_to_ptr.vmem [resolvable:$true] %s158_s30 }
  0x14   : > { %s787_s6 = scalar_lea.hbm %s1281_s0, 512 }
  0x15   : > { %p1069_p5 = pnand %p709_p13, %p1285_p3  ;;  %p788_p7 = scmp.ne.s32.totalorder %s1281_s0, %s787_s6 }
  0x16   : > { %p794_p13 = scmp.lt.u32.totalorder %s787_s6, %s1281_s0 }
  0x17   : > { %p789_p9 = pneg %p1069_p5 }
  0x19   : > { %p790_p4 = pnand %p789_p9, %p788_p7 }
  0x1b   : > { %p791_p11 = pneg %p790_p4 }
  0x1d   : > { %p796_p1 = pnand %p794_p13, %p791_p11 }
  0x1f   : > { %799 = shalt.err (!%p796_p1)
}
  0x20   : > { %s800_s11 = scalar_lea.vmem %s1061_s26, 512  ;;  %p808_p8 = scmp.lt.s32.totalorder %s1061_s26, %s1061_s26 }
  0x21   : > { %p801_p0 = scmp.ne.s32.totalorder %s1061_s26, %s800_s11  ;;  %p809_p7 = scmp.lt.s32.totalorder %s800_s11, %s800_s11 }
  0x23   : > { %p803_p3 = pnand %p801_p0, %p789_p9  ;;  %p810_p4 = por %p809_p7, %p808_p8 }
  0x25   : > { %p804_p10 = pneg %p803_p3 }
  0x27   : > { %p811_p6 = pnand %p810_p4, %p804_p10 }
  0x29   : > { %814 = shalt.err (!%p811_p6)
}
  0x2a   : > { %s967_s19 = smov 128   ;;  %s968_s20 = smov 8  }
  0x2b   : > { %712 = dma.hbm_to_vmem [thread:$0]  (!%p1069_p5), %s1281_s0, 512, %s1061_s26, [#allocation4], %s967_s19, %s967_s19, %s968_s20  }
  0x2c   : > { %s815_s6 = scalar_lea.hbm %s1282_s1, 512 }
  0x2d   : > { %p816_p3 = scmp.ne.s32.totalorder %s1282_s1, %s815_s6  ;;  %p822_p10 = scmp.lt.u32.totalorder %s815_s6, %s1282_s1 }
  0x2f   : > { %p818_p6 = pnand %p816_p3, %p789_p9 }
  0x31   : > { %p819_p8 = pneg %p818_p6 }
  0x33   : > { %p824_p0 = pnand %p822_p10, %p819_p8 }
  0x35   : > { %827 = shalt.err (!%p824_p0)
}
  0x36   : > { %s828_s26 = scalar_lea.vmem %s1079_s30, 512  ;;  %p836_p7 = scmp.lt.s32.totalorder %s1079_s30, %s1079_s30 }
  0x37   : > { %p829_p11 = scmp.ne.s32.totalorder %s1079_s30, %s828_s26  ;;  %p837_p4 = scmp.lt.s32.totalorder %s828_s26, %s828_s26 }
  0x39   : > { %p831_p13 = pnand %p829_p11, %p789_p9  ;;  %p838_p3 = por %p837_p4, %p836_p7 }
  0x3b   : > { %p832_p1 = pneg %p831_p13 }
  0x3d   : > { %p839_p6 = pnand %p838_p3, %p832_p1 }
  0x3f   : > { %842 = shalt.err (!%p839_p6)
}
  0x40   : > { %715 = dma.hbm_to_vmem [thread:$0]  (!%p1069_p5), %s1282_s1, 512, %s1079_s30, [#allocation7], %s967_s19, %s967_s19, %s968_s20  }
  0x41   : > { %s81_s29 = sadd.s32 1, %s951_s14  ;;  %s30_s4 = sadd.s32 1, %s959_s16 }
  0x42   : > { %s172_s5 = sand.u32 1, %s963_s17   ;;  %p32_p9 = scmp.ge.s32.totalorder %s30_s4, 2 }
  0x43   : > { %s174_s6 = sand.u32 1, %s951_s14   ;;  %s653_s27 = sshll.u32 %s959_s16, 10 }
  0x44   : > { %s1309_s4 = smov (%p32_p9, %s30_s4), 0  ;;  %s632_s7 = sshll.u32 %s174_s6, 6 }
  0x45   : > { %s1143_s10 = scalar_lea.hbm %s1283_s2, %s653_s27  ;;  %s76_s30 = ssub.s32 %s959_s16, %s1309_s4 }
  0x46   : > { %p79_p5 = scmp.eq.s32.totalorder %s76_s30, 0  ;;  %s176_s19 = scalar_lea.vmem [#allocation8], %s632_s7 }
  0x47   : > { %s185_s20 = sshll.u32 %s176_s19, 4  ;;  %s1152_s11 = scalar_lea.sflag [#allocation4], %s172_s5  ;;  %s1147_s20 = int_to_ptr.vmem [resolvable:$true] %s185_s20 }
  0x48   : > { %s1150_s26 = scalar_select %p79_p5, %s951_s14, %s81_s29  }
  0x49   : > { %s843_s25 = scalar_lea.hbm %s1143_s10, 1024  ;;  %p845_p10 = pneg %p1075_p2 }
  0x4a   : > { %p844_p8 = scmp.ne.s32.totalorder %s1143_s10, %s843_s25  ;;  %s848_s8 = scalar_lea.hbm %s1283_s2, 2048 }
  0x4b   : > { %p849_p13 = scmp.lt.u32.totalorder %s1143_s10, %s1283_s2  ;;  %p850_p1 = scmp.lt.u32.totalorder %s848_s8, %s843_s25 }
  0x4c   : > { %p846_p0 = pnand %p845_p10, %p844_p8  ;;  %p852_p4 = scmp.lt.u32.totalorder %s843_s25, %s1143_s10 }
  0x4d   : > { %p851_p7 = por %p850_p1, %p849_p13 }
  0x4e   : > { %p847_p11 = pneg %p846_p0 }
  0x4f   : > { %p853_p3 = por %p852_p4, %p851_p7 }
  0x51   : > { %p854_p6 = pnand %p853_p3, %p847_p11 }
  0x53   : > { %857 = shalt.err (!%p854_p6)
}
  0x54   : > { %s858_s29 = scalar_lea.vmem %s1147_s20, 1024  ;;  %s969_s5 = smov [#allocation8]  }
  0x55   : > { %p859_p9 = scmp.ne.s32.totalorder %s1147_s20, %s858_s29  ;;  %s863_s30 = sshll.u32 %s969_s5, 4  ;;  %s864_s30 = int_to_ptr.vmem [resolvable:$false] %s863_s30 }
  0x56   : > { %s865_s19 = scalar_lea.vmem %s864_s30, 2048  ;;  %p866_p0 = scmp.lt.s32.totalorder %s1147_s20, %s864_s30 }
  0x57   : > { %p861_p5 = pnand %p859_p9, %p845_p10  ;;  %p867_p13 = scmp.lt.s32.totalorder %s865_s19, %s858_s29 }
  0x59   : > { %p862_p8 = pneg %p861_p5  ;;  %p868_p1 = por %p867_p13, %p866_p0 }
  0x5b   : > { %p869_p7 = pnand %p868_p1, %p862_p8 }
  0x5d   : > { %872 = shalt.err (!%p869_p7)
}
  0x5e   : > { %s970_s25 = smov 256   ;;  %s971_s6 = smov 16  }
  0x5f   : > { %719 = dma.hbm_to_vmem [thread:$0]  (!%p1075_p2), %s1143_s10, 1024, %s1147_s20, %s1152_s11, %s970_s25, %s970_s25, %s971_s6  }
  0x60   : > { %197 = sbr.rel (%p1057_p12) target bundleno = 713 (0x2c9), region = 32  ;;  %p1295_p10 = scmp.eq.s32.totalorder (!%p1057_p12), %s1027_s18, 0 }
  0x67   : > { %926 = dma.done.wait (%p1295_p10), [#allocation4], 512   ;;  %p1296_p11 = pmov %p1295_p10 }
  0x68   : > { %p1297_p4 = pmov %p1295_p10 }
  0x69   : > { %928 = vsyncadd (%p1296_p11), [#allocation4], 4294966784 }
  0x6a   : > { %930 = dma.done.wait (%p1297_p4), [#allocation7], 512   ;;  %p1298_p3 = pmov %p1297_p4 }
  0x6b   : > { %s207_s28 = sand.u32 1, %s1027_s18   ;;  %s209_s10 = sand.u32 1, %s947_s13  }
  0x6c   : > { %932 = vsyncadd (%p1298_p3), [#allocation7], 4294966784  ;;  %s1194_s24 = sshll.u32 %s209_s10, 6  ;;  %s208_s20 = scalar_lea.sflag [#allocation4], %s207_s28 }
  0x6d   : > { %s1197_s11 = scalar_lea.vmem [#allocation8], %s1194_s24  ;;  %p1299_p12 = scmp.ne.s32.totalorder %s1289_s21, 0 }
  0x6f   : > { %934 = dma.done.wait (%p1299_p12), %s208_s20, 1024  }
  0x70   : > { %936 = vsyncadd (%p1299_p12), %s208_s20, 4294966272  ;;  %vm248_vm0 = vcmask 261120   ;;  %v244_v0 = vld [vmem:[#allocation6] sm:$0xff]  ;;  %v245_v1 = vld [vmem:[#allocation6 + $0x8] sm:$0xff]  ;;  %v972_v26 = vmov 0.0   ;;  %s233_s18 = scalar_lea.vmem [#allocation9], %s1194_s24 }
  0x71   : > { %v246_v2 = vld [vmem:[#allocation6 + $0x10] sm:$0xff]  ;;  %v677_v3 = vpack.c.bf16 %v245_v1, %v244_v0  ;;  %v247_v4 = vld [vmem:[#allocation6 + $0x18] sm:$0xff]  ;;  %v240_v5 = vld [vmem:[#allocation3] sm:$0xff]  ;;  %477 = vmatprep.mubr.f32.mxu1 %v972_v26  ;;  %s520_s21 = sshll.u32 %s233_s18, 4  ;;  %s654_s27 = sshll.u32 %s955_s15, 10  ;;  %s1225_s21 = int_to_ptr.vmem [resolvable:$true] %s520_s21 }
  0x72   : > { %v681_v6 = vpack.c.bf16 %v247_v4, %v246_v2  ;;  %671 = vmatprep.mubr.msk.f32.mxu0 %vm248_vm0, %v240_v5  ;;  %v241_v7 = vld [vmem:[#allocation3 + $0x8] sm:$0xff]  ;;  %v242_v8 = vld [vmem:[#allocation3 + $0x10] sm:$0xff]  ;;  %v243_v9 = vld [vmem:[#allocation3 + $0x18] sm:$0xff]  ;;  %s1230_s9 = scalar_lea.hbm %s1284_s3, %s654_s27  ;;  %s1234_s29 = scalar_lea.sflag [#allocation5], %s209_s10 }
  0x73   : > { %678 = vmatprep.subr.bf16.mxu0 %v677_v3  ;;  %v387_v11 = vld [vmem:[%s1197_s11 + $0x8] sm:$0xff]  ;;  %v389_v12 = vld [vmem:[%s1197_s11 + $0x18] sm:$0xff]  ;;  %v386_v15 = vld [vmem:[%s1197_s11] sm:$0xff]  ;;  %s873_s15 = scalar_lea.vmem %s1225_s21, 1024  ;;  %p1300_p6 = scmp.ne.s32.totalorder %s1290_s22, 0 }
  0x74   : > { %680 = vmatpush3.bf16.msra.mxu0 %v677_v3  ;;  %v685_v14 = vpack.c.bf16 %v389_v12, %v387_v11  ;;  %v388_v16 = vld [vmem:[%s1197_s11 + $0x10] sm:$0xff]  ;;  %v391_v19 = vld [vmem:[%s1197_s11 + $0x28] sm:$0xff]  ;;  %v393_v20 = vld [vmem:[%s1197_s11 + $0x38] sm:$0xff]  ;;  %p874_p2 = scmp.ne.s32.totalorder %s1225_s21, %s873_s15  ;;  %s973_s5 = smov [#allocation9]  }
  0x75   : > { %682 = vmatprep.subr.bf16.mxu0 %v681_v6  ;;  %v687_v17 = vpack.c.bf16 %v388_v16, %v386_v15  ;;  %v689_v22 = vpack.c.bf16 %v393_v20, %v391_v19  ;;  %v390_v23 = vld [vmem:[%s1197_s11 + $0x20] sm:$0xff]  ;;  %v392_v24 = vld [vmem:[%s1197_s11 + $0x30] sm:$0xff]  ;;  %s877_s30 = sshll.u32 %s973_s5, 4  ;;  %s878_s30 = int_to_ptr.vmem [resolvable:$false] %s877_s30 }
  0x76   : > { %693 = vmatprep.subr.bf16.mxu1 %v685_v14  ;;  %v691_v25 = vpack.c.bf16 %v392_v24, %v390_v23  ;;  %p875_p9 = pnand %p874_p2, %p1300_p6  ;;  %s879_s19 = scalar_lea.vmem %s878_s30, 2048 }
  0x77   : > { %695 = vmatpush1.bf16.msra.mxu1 %v687_v17  ;;  %p880_p8 = scmp.lt.s32.totalorder %s1225_s21, %s878_s30  ;;  %p881_p0 = scmp.lt.s32.totalorder %s879_s19, %s873_s15 }
  0x78   : > { %684 = vmatpush3.bf16.msra.mxu0 %v681_v6  ;;  %694 = vmatprep.subr.bf16.mxu1 %v689_v22  ;;  %p876_p5 = pneg %p875_p9 }
  0x79   : > { %686 = vmatprep.subr.bf16.mxu0 %v685_v14  ;;  %p882_p13 = por %p881_p0, %p880_p8 }
  0x7b   : > { %672 = vmatmul.mubr.msk.f32.vlgmr.msra.gmra.mrb[0].mxu0 %vm248_vm0, %v241_v7  ;;  %696 = vmatpush1.bf16.msra.mxu1 %v691_v25  ;;  %p883_p1 = pnand %p882_p13, %p876_p5 }
  0x7c   : > { %674 = vmatprep.mubr.msk.f32.mxu0 %vm248_vm0, %v242_v8  ;;  %688 = vmatpush1.bf16.msra.mxu0 %v687_v17 }
  0x7d   : > { %690 = vmatprep.subr.bf16.mxu0 %v689_v22 }
  0x7f   : > { %675 = vmatmul.mubr.msk.f32.gmra.mrb[2].mxu0 %vm248_vm0, %v243_v9 }
  0x80   : > { %692 = vmatpush1.bf16.msra.mxu0 %v691_v25  ;;  %471 = vmatprep.mubr.f32.mxu0 %v972_v26 }
 0x14e   : > { %v673_v10 = vpop.f32.mrb[0].mxu0 }
 0x14f   : > { %v327_v13 = vpop.f32.mrb[1].mxu0 }
 0x150   : > { %346 = vxpose.xlu0.b32.start [1/4] (short) (narrow) %v327_v13, 32 }
 0x152   : > { %v676_v18 = vpop.f32.mrb[2].mxu0 }
 0x153   : > { %v337_v21 = vpop.f32.mrb[3].mxu0 }
 0x154   : > { %347 = vxpose.xlu0.b32.cont [2/4] (short) (narrow) %v673_v10, 32 }
 0x158   : > { %348 = vxpose.xlu0.b32.cont [3/4] (short) (narrow) %v337_v21, 32 }
 0x15c   : > { %349 = vxpose.xlu0.b32.end [4/4] (short) (narrow) %v676_v18, 32 }
 0x1d0   : > { %v362_v27 = vpop.trf.xlu0 }
 0x1d1   : > { %378 = vst.msk [vmem:[#allocation2] sm:$0xff] %vm248_vm0, %v362_v27 }
 0x1d4   : > { %v363_v28 = vpop.trf.xlu0 }
 0x1d5   : > { %379 = vst.msk [vmem:[#allocation2 + $0x8] sm:$0xff] %vm248_vm0, %v363_v28 }
 0x1d8   : > { %v364_v29 = vpop.trf.xlu0  ;;  %v382_v30 = vld [vmem:[#allocation2] sm:$0xff] }
 0x1d9   : > { %380 = vst.msk [vmem:[#allocation2 + $0x10] sm:$0xff] %vm248_vm0, %v364_v29  ;;  %644 = vmatmul.mubr.msk.f32.vlgmr.msra.gmra.mrb[4].mxu0 %vm248_vm0, %v382_v30 }
 0x1dc   : > { %v365_v31 = vpop.trf.xlu0  ;;  %v383_v32 = vld [vmem:[#allocation2 + $0x8] sm:$0xff] }
 0x1dd   : > { %381 = vst.msk [vmem:[#allocation2 + $0x18] sm:$0xff] %vm248_vm0, %v365_v31  ;;  %645 = vmatmul.mubr.msk.f32.vlgmr.msra.gmra.mrb[0].mxu1 %vm248_vm0, %v383_v32 }
 0x1de   : > { %483 = vmatprep.mubr.f32.mxu1 %v972_v26 }
 0x1e0   : > { %v384_v33 = vld [vmem:[#allocation2 + $0x10] sm:$0xff] }
 0x1e1   : > { %646 = vmatmul.mubr.msk.f32.gmra.mrb[2].mxu1 %vm248_vm0, %v384_v33 }
 0x1e2   : > { %489 = vmatprep.mubr.f32.mxu1 %v972_v26 }
 0x1e4   : > { %v385_v34 = vld [vmem:[#allocation2 + $0x18] sm:$0xff] }
 0x1e5   : > { %647 = vmatmul.mubr.msk.f32.gmra.mrb[4].mxu1 %vm248_vm0, %v385_v34 }
 0x2ac   : > { %v473_v35 = vpop.f32.mrb[4].mxu0 }
 0x2ad   : > { %496 = vst [vmem:[%s233_s18] sm:$0xff] %v473_v35  ;;  %v475_v36 = vpop.f32.mrb[5].mxu0 }
 0x2ae   : > { %497 = vst [vmem:[%s233_s18 + $0x8] sm:$0xff] %v475_v36 }
 0x2b0   : > { %v479_v37 = vpop.f32.mrb[0].mxu1 }
 0x2b1   : > { %498 = vst [vmem:[%s233_s18 + $0x10] sm:$0xff] %v479_v37  ;;  %v481_v38 = vpop.f32.mrb[1].mxu1 }
 0x2b2   : > { %499 = vst [vmem:[%s233_s18 + $0x18] sm:$0xff] %v481_v38 }
 0x2b4   : > { %v485_v39 = vpop.f32.mrb[2].mxu1 }
 0x2b5   : > { %500 = vst [vmem:[%s233_s18 + $0x20] sm:$0xff] %v485_v39  ;;  %v487_v40 = vpop.f32.mrb[3].mxu1 }
 0x2b6   : > { %501 = vst [vmem:[%s233_s18 + $0x28] sm:$0xff] %v487_v40 }
 0x2b8   : > { %v491_v41 = vpop.f32.mrb[4].mxu1 }
 0x2b9   : > { %502 = vst [vmem:[%s233_s18 + $0x30] sm:$0xff] %v491_v41  ;;  %v493_v42 = vpop.f32.mrb[5].mxu1 }
 0x2ba   : > { %503 = vst [vmem:[%s233_s18 + $0x38] sm:$0xff] %v493_v42 }
 0x2bb   : > { %886 = shalt.err (!%p883_p1)
}
 0x2bc   : > { %s887_s25 = scalar_lea.hbm %s1230_s9, 1024  ;;  %s891_s10 = scalar_lea.hbm %s1284_s3, 2048 }
 0x2bd   : > { %p888_p7 = scmp.ne.s32.totalorder %s1230_s9, %s887_s25  ;;  %p892_p4 = scmp.lt.u32.totalorder %s1230_s9, %s1284_s3 }
 0x2be   : > { %p893_p3 = scmp.lt.u32.totalorder %s891_s10, %s887_s25  ;;  %p895_p2 = scmp.lt.u32.totalorder %s887_s25, %s1230_s9 }
 0x2bf   : > { %p889_p10 = pnand %p888_p7, %p1300_p6 }
 0x2c0   : > { %p894_p12 = por %p893_p3, %p892_p4 }
 0x2c1   : > { %p890_p11 = pneg %p889_p10 }
 0x2c2   : > { %p896_p9 = por %p895_p2, %p894_p12 }
 0x2c4   : > { %p897_p5 = pnand %p896_p9, %p890_p11 }
 0x2c6   : > { %900 = shalt.err (!%p897_p5)
}
 0x2c7   : > { %s974_s11 = smov 256   ;;  %s975_s18 = smov 16  }
 0x2c8   : > { %707 = dma.vmem_to_hbm [thread:$0]  (%p1300_p6), %s1225_s21, 1024, %s1230_s9, %s1234_s29, %s974_s11, %s974_s11, %s975_s18  }
 0x2c9 PF: > { %s535_s27 = sand.u32 1, %s943_s12   ;;  %p1301_p8 = scmp.ne.s32.totalorder %s1291_s23, 0 }
 0x2ca   : > { %p1302_p0 = scmp.ge.s32.totalorder %s963_s17, 2  ;;  %s536_s8 = scalar_lea.sflag [#allocation5], %s535_s27 }
 0x2cc   : > { %p721_p13 = pnand %p1302_p0, %p1301_p8 }
 0x2ce   : > { %938 = dma.done.wait (!%p721_p13), %s536_s8, 1024  }
 0x2cf   : > { %940 = vsyncadd (!%p721_p13), %s536_s8, 4294966272  ;;  %s18_s17 = sadd.s32 1, %s963_s17   ;;  %s1303_s12 = smov %s947_s13 }
 0x2d0   : > { %p15_p1 = scmp.ge.s32.totalorder %s18_s17, 4   ;;  %s1304_s13 = smov %s951_s14 }
 0x2d1   : > { %s1305_s14 = smov %s1150_s26  ;;  %s1306_s15 = smov %s959_s16 }
 0x2d2   : > { %s1307_s16 = smov %s1309_s4  ;;  %17 = sbr.rel (!%p15_p1) target bundleno = 6 (0x6), region = 88 }
 0x2d9   :  { %541 = vsyncpa [#allocation4], 1 }
 0x2da   :  { %543 = vsyncpa [#allocation4 + $0x1], 1 }
 0x2db   :  { %544 = vsyncpa [#allocation7], 1 }
 0x2dc   :  { %545 = vsyncpa [#allocation5], 1 }
 0x2dd   :  { %547 = vsyncpa [#allocation5 + $0x1], 1 }

</bundles_post_ra>
